<compile_context>
chip_gen: v5e
topology: v5e:2x2
jax: 0.10.0
libtpu: 0.0.40
codegen_flags: <defaults>
</compile_context>

<pallas_src>
import numpy as np
import jax
import jax.numpy as jnp
from jax import lax
from jax.experimental import pallas as pl
from jax.experimental.pallas import tpu as pltpu


def _build_kernel4x4() -> np.ndarray:
    """Rebuild the module's fused 4x4 blur kernel (used by the reference check)."""
    k = np.array([[1, 2, 1], [2, 4, 2], [1, 2, 1]], dtype=np.float32) / 16.0
    pads = [[(0, 1), (0, 1)], [(0, 1), (1, 0)], [(1, 0), (0, 1)], [(1, 0), (1, 0)]]
    return np.stack([np.pad(k, p, "constant") for p in pads]).sum(0)  # (4, 4)


_K4 = _build_kernel4x4()

# Separable factorization: _K4 == outer(v, v) with v = [1, 3, 3, 1] / 4.
_W_LO = 0.25
_W_HI = 0.75


def _blur_kernel(x_ref, o_ref, t_ref):
    """One channel block: x (nc, Hin, Win) -> o (nc, Hin-1, Win-1).

    t_ref is a (nc, Hout, Win) f32 VMEM scratch holding the vertical-pass result.
    The conv's zero padding is folded into dedicated 3-tap boundary expressions,
    so no padded copy of the slab is ever materialized.
    """
    hin, win = x_ref.shape[1], x_ref.shape[2]
    hout, wout = hin - 1, win - 1

    x = x_ref[...].astype(jnp.float32)                       # (nc, hin, win)

    # ---- Vertical 4-tap pass (sublane-axis slices) -> t_ref -------------------
    if hout == 1:                                            # Hin == 2: both pad taps are zero
        t_ref[:, 0:1, :] = _W_HI * (x[:, 0:1, :] + x[:, 1:2, :])
    else:
        if hout > 2:                                         # interior rows (full 4-tap)
            t_ref[:, 1:hout - 1, :] = (
                _W_LO * (x[:, 0:hout - 2, :] + x[:, 3:hout + 1, :]) +
                _W_HI * (x[:, 1:hout - 1, :] + x[:, 2:hout, :]))
        # top row: x[-1] == 0
        t_ref[:, 0:1, :] = (_W_HI * (x[:, 0:1, :] + x[:, 1:2, :]) +
                            _W_LO * x[:, 2:3, :])
        # bottom row: x[Hin] == 0
        t_ref[:, hout - 1:hout, :] = (
            _W_LO * x[:, hout - 2:hout - 1, :] +
            _W_HI * (x[:, hout - 1:hout, :] + x[:, hout:hout + 1, :]))

    t = t_ref[...]                                           # (nc, hout, win)

    # ---- Horizontal 4-tap pass (lane-axis slices) -> o_ref --------------------
    if wout == 1:                                            # Win == 2
        o_ref[:, :, 0:1] = (_W_HI * (t[:, :, 0:1] + t[:, :, 1:2])).astype(o_ref.dtype)
    else:
        if wout > 2:                                         # interior columns (full 4-tap)
            o_ref[:, :, 1:wout - 1] = (
                _W_LO * (t[:, :, 0:wout - 2] + t[:, :, 3:wout + 1]) +
                _W_HI * (t[:, :, 1:wout - 1] + t[:, :, 2:wout])).astype(o_ref.dtype)
        # left column: t[:, :, -1] == 0
        o_ref[:, :, 0:1] = (_W_HI * (t[:, :, 0:1] + t[:, :, 1:2]) +
                            _W_LO * t[:, :, 2:3]).astype(o_ref.dtype)
        # right column: t[:, :, Win] == 0
        o_ref[:, :, wout - 1:wout] = (
            _W_LO * t[:, :, wout - 2:wout - 1] +
            _W_HI * (t[:, :, wout - 1:wout] + t[:, :, wout:wout + 1])).astype(o_ref.dtype)


def _vmem_capacity_bytes() -> int:
    """Physical VMEM per TensorCore; conservative (v7x) fallback if unavailable."""
    try:
        return int(pltpu.get_tpu_info().vmem_capacity_bytes)
    except Exception:
        return 64 << 20


def _pick_nc_block(nc: int, hin: int, win: int, dtype, budget: int) -> int:
    """Channel-block size along the untiled leading N*C axis.

    Must divide nc.  Prefer, in order: an even grid with >= 4 steps (keeps both
    v7x TensorCores busy with >= 2 pipelined steps each), then any grid >= 2
    (DMA/compute overlap), then the largest block that fits the VMEM budget.
    """
    itemsize = np.dtype(dtype).itemsize
    sub = 8 * max(1, 4 // itemsize)                 # sublane packing: f32->8, bf16->16, i8->32
    ru = lambda a, m: -(-a // m) * m

    def vmem_bytes(d):
        in_blk = d * ru(hin, sub) * ru(win, 128) * itemsize
        out_blk = d * ru(hin - 1, sub) * ru(win - 1, 128) * itemsize
        t_blk = d * ru(hin - 1, 8) * ru(win, 128) * 4          # f32 scratch
        # double-buffered in/out blocks + scratch + ~2 slab-sized temporaries
        return 2 * (in_blk + out_blk) + t_blk + 2 * in_blk

    divs = [d for d in range(1, nc + 1) if nc % d == 0]
    fitting = [d for d in divs if vmem_bytes(d) <= budget]
    if not fitting:
        # TODO(synk): H-tiling with a 3-row halo for slabs that exceed VMEM even
        # at a single channel; fall back to the smallest block for now.
        return 1
    best4 = [d for d in fitting if (nc // d) >= 4 and (nc // d) % 2 == 0]
    if best4:
        return max(best4)
    best2 = [d for d in fitting if (nc // d) >= 2]
    if best2:
        return max(best2)
    return max(fitting)


@jax.jit
def fused_blur3x3(x: jax.Array) -> jax.Array:
    """x: (N, C, Hin, Win) -> (N, C, Hin-1, Win-1); matches FusedBlur3x3.forward."""
    N, C, Hin, Win = x.shape
    if Hin < 2 or Win < 2:
        raise ValueError("FusedBlur3x3 requires spatial dims >= 2 (output is H-1, W-1).")
    Hout, Wout = Hin - 1, Win - 1
    NC = N * C

    cap = _vmem_capacity_bytes()
    vmem_limit = (cap * 3) // 4                      # ~96 MiB on v5e/v6e, ~48 MiB on v7x
    nc_blk = _pick_nc_block(NC, Hin, Win, x.dtype, budget=cap // 2)
    grid = (NC // nc_blk,)

    xf = x.reshape(NC, Hin, Win)                     # native NCHW; no HBM transpose

    y = pl.pallas_call(
        _blur_kernel,
        out_shape=jax.ShapeDtypeStruct((NC, Hout, Wout), x.dtype),
        grid=grid,
        in_specs=[pl.BlockSpec((nc_blk, Hin, Win), lambda g: (g, 0, 0))],
        out_specs=pl.BlockSpec((nc_blk, Hout, Wout), lambda g: (g, 0, 0)),
        scratch_shapes=[pltpu.VMEM((nc_blk, Hout, Win), jnp.float32)],
        compiler_params=pltpu.CompilerParams(
            dimension_semantics=("parallel",),       # channel axis -> v7x 2-TC sharding
            vmem_limit_bytes=int(vmem_limit)),
    )(xf)

    return y.reshape(N, C, Hout, Wout)


def _reference(x: jax.Array) -> jax.Array:
    """Independent reference: grouped conv via lax.conv_general_dilated."""
    C = x.shape[1]
    w = jnp.broadcast_to(jnp.asarray(_K4)[None, None], (C, 1, 4, 4))  # OIHW
    return lax.conv_general_dilated(
        x, w, window_strides=(1, 1), padding=((1, 1), (1, 1)),
        dimension_numbers=("NCHW", "OIHW", "NCHW"),
        feature_group_count=C, precision=lax.Precision.HIGHEST)


if __name__ == "__main__":
    # Sanity-check the separable factorization baked into the kernel.
    v = np.array([_W_LO, _W_HI, _W_HI, _W_LO], dtype=np.float32)
    np.testing.assert_allclose(_K4, np.outer(v, v), rtol=0, atol=1e-7)

    key = jax.random.PRNGKey(0)
    # Small shapes: the module spec default, an odd-spatial case, and NC=128.
    for shape in ((2, 4, 16, 16), (2, 4, 17, 17), (2, 64, 9, 9)):
        x = jax.random.normal(key, shape, dtype=jnp.float32)
        out = jax.block_until_ready(fused_blur3x3(x))
        ref = jax.block_until_ready(_reference(x))
        assert out.shape == (shape[0], shape[1], shape[2] - 1, shape[3] - 1), out.shape
        np.testing.assert_allclose(np.asarray(out), np.asarray(ref),
                                   rtol=1e-5, atol=1e-5)
    print("KERNEL_OK")
</pallas_src>

<mosaic_0001>
module attributes {stable_mosaic.version = 11 : i64} {
  func.func @_blur_kernel(%arg0: i32, %arg1: memref<2x16x16xf32, #tpu.memory_space<vmem>>, %arg2: memref<2x15x15xf32, #tpu.memory_space<vmem>>, %arg3: memref<2x15x16xf32, #tpu.memory_space<vmem>>) attributes {dimension_semantics = [#tpu.dimension_semantics<parallel>], iteration_bounds = array<i64: 4>, scalar_prefetch = 0 : i64, scratch_operands = 1 : i64, tpu.core_type = #tpu.core_type<tc>, window_params = [{transform_indices = @transform_0, window_bounds = array<i64: 2, 16, 16>}, {transform_indices = @transform_1, window_bounds = array<i64: 2, 15, 15>}]} {
    %c0 = arith.constant 0 : index
    %c0_0 = arith.constant 0 : index
    %c0_1 = arith.constant 0 : index
    %0 = vector.load %arg1[%c0, %c0_0, %c0_1] : memref<2x16x16xf32, #tpu.memory_space<vmem>>, vector<2x16x16xf32>
    %1 = vector.extract_strided_slice %0 {offsets = [0, 0, 0], sizes = [2, 13, 16], strides = [1, 1, 1]} : vector<2x16x16xf32> to vector<2x13x16xf32>
    %2 = vector.extract_strided_slice %0 {offsets = [0, 3, 0], sizes = [2, 13, 16], strides = [1, 1, 1]} : vector<2x16x16xf32> to vector<2x13x16xf32>
    %3 = arith.addf %1, %2 : vector<2x13x16xf32>
    %cst = arith.constant 2.500000e-01 : f32
    %4 = vector.broadcast %cst : f32 to vector<2x13x16xf32>
    %5 = arith.mulf %4, %3 : vector<2x13x16xf32>
    %6 = vector.extract_strided_slice %0 {offsets = [0, 1, 0], sizes = [2, 13, 16], strides = [1, 1, 1]} : vector<2x16x16xf32> to vector<2x13x16xf32>
    %7 = vector.extract_strided_slice %0 {offsets = [0, 2, 0], sizes = [2, 13, 16], strides = [1, 1, 1]} : vector<2x16x16xf32> to vector<2x13x16xf32>
    %8 = arith.addf %6, %7 : vector<2x13x16xf32>
    %cst_2 = arith.constant 7.500000e-01 : f32
    %9 = vector.broadcast %cst_2 : f32 to vector<2x13x16xf32>
    %10 = arith.mulf %9, %8 : vector<2x13x16xf32>
    %11 = arith.addf %5, %10 : vector<2x13x16xf32>
    %c0_3 = arith.constant 0 : index
    %c1 = arith.constant 1 : index
    %c0_4 = arith.constant 0 : index
    %12 = vector.load %arg3[%c0_3, %c1, %c0_4] : memref<2x15x16xf32, #tpu.memory_space<vmem>>, vector<2x13x16xf32>
    tpu.vector_store %arg3[%c0_3, %c1, %c0_4], %11 {strides = array<i32>} : memref<2x15x16xf32, #tpu.memory_space<vmem>>, vector<2x13x16xf32>,
    %13 = vector.extract_strided_slice %0 {offsets = [0, 0, 0], sizes = [2, 1, 16], strides = [1, 1, 1]} : vector<2x16x16xf32> to vector<2x1x16xf32>
    %14 = vector.extract_strided_slice %0 {offsets = [0, 1, 0], sizes = [2, 1, 16], strides = [1, 1, 1]} : vector<2x16x16xf32> to vector<2x1x16xf32>
    %15 = arith.addf %13, %14 : vector<2x1x16xf32>
    %cst_5 = arith.constant 7.500000e-01 : f32
    %16 = vector.broadcast %cst_5 : f32 to vector<2x1x16xf32>
    %17 = arith.mulf %16, %15 : vector<2x1x16xf32>
    %18 = vector.extract_strided_slice %0 {offsets = [0, 2, 0], sizes = [2, 1, 16], strides = [1, 1, 1]} : vector<2x16x16xf32> to vector<2x1x16xf32>
    %cst_6 = arith.constant 2.500000e-01 : f32
    %19 = vector.broadcast %cst_6 : f32 to vector<2x1x16xf32>
    %20 = arith.mulf %19, %18 : vector<2x1x16xf32>
    %21 = arith.addf %17, %20 : vector<2x1x16xf32>
    %c0_7 = arith.constant 0 : index
    %c0_8 = arith.constant 0 : index
    %c0_9 = arith.constant 0 : index
    %22 = vector.load %arg3[%c0_7, %c0_8, %c0_9] : memref<2x15x16xf32, #tpu.memory_space<vmem>>, vector<2x1x16xf32>
    tpu.vector_store %arg3[%c0_7, %c0_8, %c0_9], %21 {strides = array<i32>} : memref<2x15x16xf32, #tpu.memory_space<vmem>>, vector<2x1x16xf32>,
    %23 = vector.extract_strided_slice %0 {offsets = [0, 13, 0], sizes = [2, 1, 16], strides = [1, 1, 1]} : vector<2x16x16xf32> to vector<2x1x16xf32>
    %cst_10 = arith.constant 2.500000e-01 : f32
    %24 = vector.broadcast %cst_10 : f32 to vector<2x1x16xf32>
    %25 = arith.mulf %24, %23 : vector<2x1x16xf32>
    %26 = vector.extract_strided_slice %0 {offsets = [0, 14, 0], sizes = [2, 1, 16], strides = [1, 1, 1]} : vector<2x16x16xf32> to vector<2x1x16xf32>
    %27 = vector.extract_strided_slice %0 {offsets = [0, 15, 0], sizes = [2, 1, 16], strides = [1, 1, 1]} : vector<2x16x16xf32> to vector<2x1x16xf32>
    %28 = arith.addf %26, %27 : vector<2x1x16xf32>
    %cst_11 = arith.constant 7.500000e-01 : f32
    %29 = vector.broadcast %cst_11 : f32 to vector<2x1x16xf32>
    %30 = arith.mulf %29, %28 : vector<2x1x16xf32>
    %31 = arith.addf %25, %30 : vector<2x1x16xf32>
    %c0_12 = arith.constant 0 : index
    %c14 = arith.constant 14 : index
    %c0_13 = arith.constant 0 : index
    %32 = vector.load %arg3[%c0_12, %c14, %c0_13] : memref<2x15x16xf32, #tpu.memory_space<vmem>>, vector<2x1x16xf32>
    tpu.vector_store %arg3[%c0_12, %c14, %c0_13], %31 {strides = array<i32>} : memref<2x15x16xf32, #tpu.memory_space<vmem>>, vector<2x1x16xf32>,
    %c0_14 = arith.constant 0 : index
    %c0_15 = arith.constant 0 : index
    %c0_16 = arith.constant 0 : index
    %33 = vector.load %arg3[%c0_14, %c0_15, %c0_16] : memref<2x15x16xf32, #tpu.memory_space<vmem>>, vector<2x15x16xf32>
    %34 = vector.extract_strided_slice %33 {offsets = [0, 0, 0], sizes = [2, 15, 13], strides = [1, 1, 1]} : vector<2x15x16xf32> to vector<2x15x13xf32>
    %35 = vector.extract_strided_slice %33 {offsets = [0, 0, 3], sizes = [2, 15, 13], strides = [1, 1, 1]} : vector<2x15x16xf32> to vector<2x15x13xf32>
    %36 = arith.addf %34, %35 : vector<2x15x13xf32>
    %cst_17 = arith.constant 2.500000e-01 : f32
    %37 = vector.broadcast %cst_17 : f32 to vector<2x15x13xf32>
    %38 = arith.mulf %37, %36 : vector<2x15x13xf32>
    %39 = vector.extract_strided_slice %33 {offsets = [0, 0, 1], sizes = [2, 15, 13], strides = [1, 1, 1]} : vector<2x15x16xf32> to vector<2x15x13xf32>
    %40 = vector.extract_strided_slice %33 {offsets = [0, 0, 2], sizes = [2, 15, 13], strides = [1, 1, 1]} : vector<2x15x16xf32> to vector<2x15x13xf32>
    %41 = arith.addf %39, %40 : vector<2x15x13xf32>
    %cst_18 = arith.constant 7.500000e-01 : f32
    %42 = vector.broadcast %cst_18 : f32 to vector<2x15x13xf32>
    %43 = arith.mulf %42, %41 : vector<2x15x13xf32>
    %44 = arith.addf %38, %43 : vector<2x15x13xf32>
    %c0_19 = arith.constant 0 : index
    %c0_20 = arith.constant 0 : index
    %c1_21 = arith.constant 1 : index
    %45 = vector.load %arg2[%c0_19, %c0_20, %c1_21] : memref<2x15x15xf32, #tpu.memory_space<vmem>>, vector<2x15x13xf32>
    tpu.vector_store %arg2[%c0_19, %c0_20, %c1_21], %44 {strides = array<i32>} : memref<2x15x15xf32, #tpu.memory_space<vmem>>, vector<2x15x13xf32>,
    %46 = vector.extract_strided_slice %33 {offsets = [0, 0, 0], sizes = [2, 15, 1], strides = [1, 1, 1]} : vector<2x15x16xf32> to vector<2x15x1xf32>
    %47 = vector.extract_strided_slice %33 {offsets = [0, 0, 1], sizes = [2, 15, 1], strides = [1, 1, 1]} : vector<2x15x16xf32> to vector<2x15x1xf32>
    %48 = arith.addf %46, %47 : vector<2x15x1xf32>
    %cst_22 = arith.constant 7.500000e-01 : f32
    %49 = vector.broadcast %cst_22 : f32 to vector<2x15x1xf32>
    %50 = arith.mulf %49, %48 : vector<2x15x1xf32>
    %51 = vector.extract_strided_slice %33 {offsets = [0, 0, 2], sizes = [2, 15, 1], strides = [1, 1, 1]} : vector<2x15x16xf32> to vector<2x15x1xf32>
    %cst_23 = arith.constant 2.500000e-01 : f32
    %52 = vector.broadcast %cst_23 : f32 to vector<2x15x1xf32>
    %53 = arith.mulf %52, %51 : vector<2x15x1xf32>
    %54 = arith.addf %50, %53 : vector<2x15x1xf32>
    %c0_24 = arith.constant 0 : index
    %c0_25 = arith.constant 0 : index
    %c0_26 = arith.constant 0 : index
    %55 = vector.load %arg2[%c0_24, %c0_25, %c0_26] : memref<2x15x15xf32, #tpu.memory_space<vmem>>, vector<2x15x1xf32>
    tpu.vector_store %arg2[%c0_24, %c0_25, %c0_26], %54 {strides = array<i32>} : memref<2x15x15xf32, #tpu.memory_space<vmem>>, vector<2x15x1xf32>,
    %56 = vector.extract_strided_slice %33 {offsets = [0, 0, 13], sizes = [2, 15, 1], strides = [1, 1, 1]} : vector<2x15x16xf32> to vector<2x15x1xf32>
    %cst_27 = arith.constant 2.500000e-01 : f32
    %57 = vector.broadcast %cst_27 : f32 to vector<2x15x1xf32>
    %58 = arith.mulf %57, %56 : vector<2x15x1xf32>
    %59 = vector.extract_strided_slice %33 {offsets = [0, 0, 14], sizes = [2, 15, 1], strides = [1, 1, 1]} : vector<2x15x16xf32> to vector<2x15x1xf32>
    %60 = vector.extract_strided_slice %33 {offsets = [0, 0, 15], sizes = [2, 15, 1], strides = [1, 1, 1]} : vector<2x15x16xf32> to vector<2x15x1xf32>
    %61 = arith.addf %59, %60 : vector<2x15x1xf32>
    %cst_28 = arith.constant 7.500000e-01 : f32
    %62 = vector.broadcast %cst_28 : f32 to vector<2x15x1xf32>
    %63 = arith.mulf %62, %61 : vector<2x15x1xf32>
    %64 = arith.addf %58, %63 : vector<2x15x1xf32>
    %c0_29 = arith.constant 0 : index
    %c0_30 = arith.constant 0 : index
    %c14_31 = arith.constant 14 : index
    %65 = vector.load %arg2[%c0_29, %c0_30, %c14_31] : memref<2x15x15xf32, #tpu.memory_space<vmem>>, vector<2x15x1xf32>
    tpu.vector_store %arg2[%c0_29, %c0_30, %c14_31], %64 {strides = array<i32>} : memref<2x15x15xf32, #tpu.memory_space<vmem>>, vector<2x15x1xf32>,
    return
  }
  func.func @transform_0(%arg0: i32) -> (i32, i32, i32) {
    %c0_i32 = arith.constant 0 : i32
    %c0_i32_0 = arith.constant 0 : i32
    %c0_i32_1 = arith.constant 0 : i32
    return %arg0, %c0_i32, %c0_i32_0 : i32, i32, i32
  }
  func.func @transform_1(%arg0: i32) -> (i32, i32, i32) {
    %c0_i32 = arith.constant 0 : i32
    %c0_i32_0 = arith.constant 0 : i32
    %c0_i32_1 = arith.constant 0 : i32
    return %arg0, %c0_i32, %c0_i32_0 : i32, i32, i32
  }
}

</mosaic_0001>

<bundles_post_ra>
// kernel: fused_blur3x3.1
= control target key start
LH: loop header
LB: loop body
LE: loop exit
PB: predicated region body
PF: predicated region fallthrough
CT: control target
= control target key end

     0   :  { %6 = vsyncpa [#allocation4], 0  ;;  %s739_s0 = inlined_call_operand.hbm [shape: f32[8,16,16], index: 0, kind: input, shape index: {}]   ;;  %s740_s1 = inlined_call_operand.vmem [shape: f32[8,15,15], index: 1, kind: output, shape index: {}]  }
   0x1   :  { %8 = vsyncpa [#allocation4 + $0x1], 0  ;;  %s600_s6 = smov 0   ;;  %s602_s7 = smov 0  }
   0x2   :  { %s604_s8 = smov 0   ;;  %s606_s9 = smov 0  }
   0x3 LB: > { %s455_s10 = sadd.s32 4294967295, %s582_s9   ;;  %s620_s11 = sadd.s32 1, %s582_s9   ;;  %s582_s9 = sphi %s606_s9, %s747_s9   ;;  %s578_s8 = sphi %s604_s8, %s746_s8   ;;  %s574_s7 = sphi %s602_s7, %s745_s7   ;;  %s570_s6 = sphi %s600_s6, %s744_s6  }
   0x4   : > { %s18_s12 = ssub.s32 %s582_s9, %s620_s11  ;;  %s21_s13 = sadd.s32 1, %s578_s8 }
   0x5   : > { %p19_p0 = scmp.eq.s32.totalorder %s18_s12, 0  ;;  %p28_p1 = scmp.ne.s32.totalorder %s578_s8, %s574_s7 }
   0x6   : > { %p29_p2 = scmp.eq.s32.totalorder %s582_s9, 0  ;;  %p34_p3 = scmp.ne.s32.totalorder %s574_s7, %s570_s6 }
   0x7   : > { %s630_s14 = scalar_select %p19_p0, %s578_s8, %s21_s13  }
   0x8   : > { %p632_p4 = por %p29_p2, %p28_p1  ;;  %p35_p5 = scmp.eq.s32.totalorder %s455_s10, 0 }
   0x9   : > { %p479_p6 = scmp.lt.s32.totalorder %s582_s9, 4  ;;  %s84_s17 = sand.u32 1, %s578_s8  }
   0xa   : > { %p639_p7 = por %p35_p5, %p34_p3  ;;  %s459_s18 = sshll.u32 %s84_s17, 5 }
   0xb   : > { %s471_s19 = sshll.u32 %s582_s9, 5  ;;  %s88_s23 = scalar_lea.vmem [#allocation3], %s459_s18 }
   0xc   : > { %s94_s22 = scalar_lea.hbm %s739_s0, %s471_s19  ;;  %s97_s24 = sshll.u32 %s88_s23, 4  ;;  %s98_s24 = int_to_ptr.vmem [resolvable:$true] %s97_s24 }
   0xd   : > { %s95_s25 = sshll.u32 %s94_s22, 4  ;;  %p650_p8 = pnand %p479_p6, %p632_p4  ;;  %s96_s25 = int_to_ptr.hbm [resolvable:$true] %s95_s25 }
   0xe   : > { %p463_p9 = scmp.ge.s32.totalorder %s582_s9, 1  ;;  %s85_s27 = scalar_lea.sflag [#allocation4], %s84_s17 }
   0xf   : > { %s518_s28 = sshra.s32 %s96_s25, 4  ;;  %p522_p11 = pneg %p650_p8  ;;  %s519_s28 = int_to_ptr.hbm [resolvable:$true] %s518_s28 }
  0x10   : > { %s520_s29 = scalar_lea.hbm %s519_s28, 32  ;;  %s525_s3 = scalar_lea.hbm %s739_s0, 128 }
  0x11   : > { %p521_p10 = scmp.ne.s32.totalorder %s519_s28, %s520_s29  ;;  %p526_p0 = scmp.lt.s32.totalorder %s519_s28, %s739_s0 }
  0x12   : > { %p527_p1 = scmp.lt.s32.totalorder %s525_s3, %s520_s29 }
  0x13   : > { %p523_p12 = pnand %p522_p11, %p521_p10 }
  0x14   : > { %p528_p2 = por %p527_p1, %p526_p0 }
  0x15   : > { %p524_p13 = pneg %p523_p12 }
  0x17   : > { %p529_p3 = pnand %p528_p2, %p524_p13 }
  0x19   : > { %532 = shalt.err (!%p529_p3)
}
  0x1a   : > { %s584_s6 = smov 128   ;;  %s585_s12 = smov 8  }
  0x1b   : > { %478 = dma.hbm_to_vmem [thread:$0]  (!%p650_p8), %s96_s25, 512, %s98_s24, %s85_s27, %s584_s6, %s584_s6, %s585_s12  }
  0x1c   : > { %p105_p4 = scmp.lt.s32.totalorder %s582_s9, 5 }
  0x1e   : > { %p106_p5 = pnand %p463_p9, %p105_p4 }
  0x1f   : > { %s111_s13 = sand.u32 (!%p106_p5), 1, %s574_s7  }
  0x20   : > { %109 = sbr.rel (%p106_p5) target bundleno = 440 (0x1b8), region = 24  ;;  %s464_s15 = sshll.u32 (!%p106_p5), %s111_s13, 5 }
  0x21   : > { %s112_s17 = scalar_lea.sflag (!%p106_p5), [#allocation4], %s111_s13  ;;  %s115_s18 = scalar_lea.vmem (!%p106_p5), [#allocation3], %s464_s15 }
  0x25   : > { %565 = dma.done.wait (%p639_p7), %s112_s17, 512  }
  0x26   : > { %567 = vsyncadd (%p639_p7), %s112_s17, 4294966784  ;;  %v146_v0 = vld [vmem:[%s115_s18 + $0x10] sm:$0xff]  ;;  %v147_v1 = vld [vmem:[%s115_s18 + $0x18] sm:$0xff]  ;;  %vm152_vm0 = vcmask 1044480   ;;  %vm171_vm1 = vcmask 1046528   ;;  %vm230_vm2 = vcmask 122880  }
  0x27   : > { %v144_v2 = vld [vmem:[%s115_s18] sm:$0xff]  ;;  %v156_v3 = vrot.slane %v146_v0, 3  ;;  %v157_v4 = vrot.slane %v147_v1, 3  ;;  %v175_v5 = vrot.slane %v146_v0, 1  ;;  %v176_v6 = vrot.slane %v147_v1, 1  ;;  %v145_v7 = vld [vmem:[%s115_s18 + $0x8] sm:$0xff] }
  0x28   : > { %vm208_vm3 = vcmask 130048   ;;  %v221_v8 = vmul.f32 0.25, %v146_v0  ;;  %v153_v9 = vrot.slane %v144_v2, 3  ;;  %v154_v10 = vrot.slane %v145_v7, 3  ;;  %s586_s16 = smov 127   ;;  %s587_s19 = smov 125  }
  0x29   : > { %v172_v11 = vrot.slane %v144_v2, 1  ;;  %v158_v12 = vsel %vm152_vm0, %v156_v3, %v157_v4  ;;  %v177_v13 = vsel %vm171_vm1, %v175_v5, %v176_v6  ;;  %v185_v14 = vadd.f32 %v176_v6, %v147_v1  ;;  %s588_s20 = smov 126   ;;  %s589_s21 = smov 1  }
  0x2a   : > { %v217_v15 = vadd.f32 %v175_v5, %v146_v0  ;;  %v165_v16 = vadd.f32 %v158_v12, %v146_v0  ;;  %v184_v17 = vadd.f32 %v177_v13, %v146_v0  ;;  %v225_v18 = vrot.slane %v221_v8, 2  ;;  %s465_s22 = sshll.u32 %s455_s10, 1 }
  0x2b   : > { %v155_v19 = vsel %vm152_vm0, %v153_v9, %v154_v10  ;;  %v189_v20 = vmul.f32 0.75, %v185_v14  ;;  %v173_v22 = vrot.slane %v145_v7, 1  ;;  %vm210_vm4 = vcmask 126976   ;;  %p138_p6 = scmp.lt.s32.totalorder %s465_s22, 7 }
  0x2c   : > { %v219_v21 = vmul.f32 0.75, %v217_v15  ;;  %v188_v23 = vmul.f32 0.75, %v184_v17  ;;  %v163_v24 = vadd.f32 %v155_v19, %v144_v2  ;;  %v216_v25 = vadd.f32 %v172_v11, %v144_v2 }
  0x2d   : > { %v220_v26 = vmul.f32 0.25, %v144_v2  ;;  %v169_v27 = vmul.f32 0.25, %v165_v16  ;;  %v198_v28 = vrot.slane %v189_v20, 1  ;;  %v174_v30 = vsel %vm171_vm1, %v172_v11, %v173_v22  ;;  %s749_s22 = smov (!%p138_p6, %s465_s22), 7 }
  0x2e   : > { %v229_v29 = vadd.f32 %v225_v18, %v219_v21  ;;  %v197_v31 = vrot.slane %v188_v23, 1  ;;  %v182_v32 = vadd.f32 %v174_v30, %v144_v2  ;;  %v183_v33 = vadd.f32 %v173_v22, %v145_v7  ;;  %s472_s23 = sshll.u32 %s749_s22, 4 }
  0x2f   : > { %v218_v34 = vmul.f32 0.75, %v216_v25  ;;  %v224_v35 = vrot.slane %v220_v26, 2  ;;  %v166_v36 = vadd.f32 %v157_v4, %v147_v1  ;;  %v234_v37 = vmul.f32 0.25, %v147_v1  ;;  %s707_s26 = scalar_lea.vmem %s740_s1, %s472_s23 }
  0x30   : > { %232 = vst.msk [vmem:[#allocation2 + $0x10] sm:$0x1] %vm230_vm2, %v229_v29  ;;  %v164_v38 = vadd.f32 %v154_v10, %v145_v7  ;;  %v199_v39 = vsel %vm171_vm1, %v197_v31, %v198_v28  ;;  %v167_v40 = vmul.f32 0.25, %v163_v24  ;;  %v186_v41 = vmul.f32 0.75, %v182_v32 }
  0x31   : > { %v187_v42 = vmul.f32 0.75, %v183_v33  ;;  %v206_v43 = vadd.f32 %v199_v39, %v169_v27  ;;  %v228_v44 = vadd.f32 %v224_v35, %v218_v34  ;;  %v170_v45 = vmul.f32 0.25, %v166_v36 }
  0x32   : > { %v233_v46 = vmul.f32 0.25, %v145_v7  ;;  %v194_v47 = vrot.slane %v186_v41, 1  ;;  %v236_v49 = vadd.f32 %v234_v37, %v198_v28  ;;  %v168_v50 = vmul.f32 0.25, %v164_v38 }
  0x33   : > { %v195_v48 = vrot.slane %v187_v42, 1  ;;  %212 = vst.msk [vmem:[#allocation2 + $0x11] sm:$0xff] %vm208_vm3, %v206_v43  ;;  %v207_v51 = vadd.f32 %v198_v28, %v170_v45  ;;  %vm237_vm5 = vcmask 128005   ;;  %vm324_vm6 = vcmask 113672  }
  0x34   : > { %231 = vst.msk [vmem:[#allocation2] sm:$0x1] %vm230_vm2, %v228_v44  ;;  %vm326_vm7 = vcmask 112648   ;;  %vm356_vm8 = vcmask 6144   ;;  %vm382_vm9 = vcmask 120944   ;;  %vm354_vm10 = vcmask 7168  }
  0x35   : > { %v196_v52 = vsel %vm171_vm1, %v194_v47, %v195_v48  ;;  %v205_v53 = vadd.f32 %v195_v48, %v168_v50  ;;  %213 = vst.msk [vmem:[#allocation2 + $0x19] sm:$0x1f] %vm210_vm4, %v207_v51  ;;  %v235_v55 = vadd.f32 %v233_v46, %v195_v48  ;;  %vm380_vm11 = vcmask 121968  }
  0x36   : > { %v204_v54 = vadd.f32 %v196_v52, %v167_v40  ;;  %239 = vst.msk [vmem:[#allocation2 + $0x19] sm:$0x20] %vm237_vm5, %v236_v49 }
  0x37   : > { %211 = vst.msk [vmem:[#allocation2 + $0x9] sm:$0x1f] %vm210_vm4, %v205_v53 }
  0x38   : > { %209 = vst.msk [vmem:[#allocation2 + $0x1] sm:$0xff] %vm208_vm3, %v204_v54 }
  0x39   : > { %238 = vst.msk [vmem:[#allocation2 + $0x9] sm:$0x20] %vm237_vm5, %v235_v55 }
  0x3a   : > { %v242_v56 = vld [vmem:[#allocation2 + $0x10] sm:$0xff] }
  0x3b   : > { %272 = vrot.lane.b32.xlu1 %v242_v56, %s586_s16  ;;  %v332_v11 = vmul.f32 0.25, %v242_v56 }
  0x3d   : > { %v243_v58 = vld [vmem:[#allocation2 + $0x18] sm:$0x7f] }
  0x3e   : > { %v333_v4 = vmul.f32 0.25, %v243_v58 }
  0x3f   : > { %v240_v57 = vld [vmem:[#allocation2] sm:$0xff] }
  0x40   : > { %268 = vrot.lane.b32.xlu0 %v240_v57, %s586_s16  ;;  %248 = vrot.lane.b32.xlu2 %v240_v57, %s587_s19  ;;  %v241_v59 = vld [vmem:[#allocation2 + $0x8] sm:$0x7f]  ;;  %v330_v10 = vmul.f32 0.25, %v240_v57 }
  0x41   : > { %v331_v9 = vmul.f32 0.25, %v241_v59 }
  0x43   : > { %274 = vrot.lane.b32.xlu1 %v243_v58, %s586_s16 }
  0x48   : > { %270 = vrot.lane.b32.xlu0 %v241_v59, %s586_s16  ;;  %250 = vrot.lane.b32.xlu2 %v241_v59, %s587_s19 }
  0x4b   : > { %254 = vrot.lane.b32.xlu1 %v243_v58, %s587_s19 }
  0x50   : > { %252 = vrot.lane.b32.xlu0 %v242_v56, %s587_s19 }
  0x9a   : > { %v249_v12 = vpop.permute.xlu2 %248 }
  0x9b   : > { %v260_v14 = vadd.f32 %v249_v12, %v240_v57 }
  0x9d   : > { %v264_v15 = vmul.f32 0.25, %v260_v14 }
  0xa2   : > { %v251_v13 = vpop.permute.xlu2 %250 }
  0xa3   : > { %v261_v26 = vadd.f32 %v251_v13, %v241_v59 }
  0xa5   : > { %v265_v27 = vmul.f32 0.25, %v261_v26 }
  0xad   : > { %v273_v60 = vpop.permute.xlu1 %272 }
  0xae   : > { %v282_v61 = vadd.f32 %v273_v60, %v242_v56 }
  0xb0   : > { %v689_v62 = vmul.f32 0.75, %v282_v61 }
  0xb2   : > { %v269_v63 = vpop.permute.xlu0 %268  ;;  %296 = vrot.lane.b32.xlu1 %v689_v62, %s586_s16 }
  0xb3   : > { %v280_v0 = vadd.f32 %v269_v63, %v240_v57 }
  0xb5   : > { %v693_v1 = vmul.f32 0.75, %v280_v0  ;;  %v275_v2 = vpop.permute.xlu1 %274 }
  0xb6   : > { %v283_v3 = vadd.f32 %v275_v2, %v243_v58 }
  0xb7   : > { %292 = vrot.lane.b32.xlu2 %v693_v1, %s586_s16 }
  0xb8   : > { %v697_v6 = vmul.f32 0.75, %v283_v3 }
  0xba   : > { %v271_v5 = vpop.permute.xlu0 %270  ;;  %344 = vrot.lane.b32.xlu1 %v333_v4, %s588_s20 }
  0xbb   : > { %v281_v7 = vadd.f32 %v271_v5, %v241_v59 }
  0xbd   : > { %v285_v8 = vmul.f32 0.75, %v281_v7  ;;  %v255_v16 = vpop.permute.xlu1 %254 }
  0xbe   : > { %v263_v19 = vadd.f32 %v255_v16, %v243_v58 }
  0xbf   : > { %298 = vrot.lane.b32.xlu2 %v697_v6, %s586_s16  ;;  %294 = vrot.lane.b32.xlu0 %v285_v8, %s586_s16 }
  0xc0   : > { %v267_v20 = vmul.f32 0.25, %v263_v19 }
  0xc2   : > { %v253_v24 = vpop.permute.xlu0 %252 }
  0xc3   : > { %v262_v29 = vadd.f32 %v253_v24, %v242_v56 }
  0xc5   : > { %v266_v32 = vmul.f32 0.25, %v262_v29 }
  0xc7   : > { %340 = vrot.lane.b32.xlu0 %v331_v9, %s588_s20  ;;  %338 = vrot.lane.b32.xlu2 %v330_v10, %s588_s20 }
  0xcf   : > { %342 = vrot.lane.b32.xlu0 %v332_v11, %s588_s20 }
 0x111   : > { %v293_v17 = vpop.permute.xlu2 %292 }
 0x112   : > { %v304_v18 = vadd.f32 %v293_v17, %v264_v15  ;;  %v360_v23 = vadd.f32 %v330_v10, %v293_v17 }
 0x114   : > { %312 = vrot.lane.b32.xlu0 %v304_v18, %s589_s21 }
 0x119   : > { %v299_v21 = vpop.permute.xlu2 %298 }
 0x11a   : > { %v307_v22 = vadd.f32 %v299_v21, %v267_v20  ;;  %v363_v25 = vadd.f32 %v333_v4, %v299_v21 }
 0x11c   : > { %318 = vrot.lane.b32.xlu2 %v307_v22, %s589_s21 }
 0x121   : > { %v339_v39 = vpop.permute.xlu2 %338 }
 0x122   : > { %v350_v48 = vadd.f32 %v339_v39, %v693_v1 }
 0x124   : > { %368 = vrot.lane.b32.xlu2 %v360_v23, %s589_s21  ;;  %v297_v33 = vpop.permute.xlu1 %296 }
 0x125   : > { %v306_v34 = vadd.f32 %v297_v33, %v266_v32  ;;  %v362_v35 = vadd.f32 %v332_v11, %v297_v33 }
 0x12c   : > { %374 = vrot.lane.b32.xlu2 %v363_v25, %s589_s21  ;;  %v345_v41 = vpop.permute.xlu1 %344 }
 0x12d   : > { %v353_v45 = vadd.f32 %v345_v41, %v697_v6 }
 0x131   : > { %v295_v28 = vpop.permute.xlu0 %294 }
 0x132   : > { %v305_v30 = vadd.f32 %v295_v28, %v265_v27  ;;  %v361_v31 = vadd.f32 %v331_v9, %v295_v28 }
 0x134   : > { %314 = vrot.lane.b32.xlu1 %v305_v30, %s589_s21  ;;  %370 = vrot.lane.b32.xlu0 %v361_v31, %s589_s21 }
 0x139   : > { %v341_v36 = vpop.permute.xlu0 %340 }
 0x13a   : > { %v351_v44 = vadd.f32 %v341_v36, %v285_v8 }
 0x13c   : > { %316 = vrot.lane.b32.xlu1 %v306_v34, %s589_s21 }
 0x141   : > { %v343_v37 = vpop.permute.xlu0 %342 }
 0x142   : > { %v352_v50 = vadd.f32 %v343_v37, %v689_v62 }
 0x144   : > { %372 = vrot.lane.b32.xlu1 %v362_v35, %s589_s21 }
 0x176   : > { %v319_v40 = vpop.permute.xlu2 %318 }
 0x177   : > { %329 = vst.msk [vmem:[%s707_s26 + $0x18] sm:$0x7f] %vm326_vm7, %v319_v40 }
 0x178   : > { %359 = vst.msk [vmem:[%s707_s26 + $0x18] sm:$0x7f] %vm356_vm8, %v353_v45 }
 0x17e   : > { %v369_v42 = vpop.permute.xlu2 %368 }
 0x186   : > { %v313_v38 = vpop.permute.xlu0 %312  ;;  %v375_v47 = vpop.permute.xlu2 %374 }
 0x187   : > { %325 = vst.msk [vmem:[%s707_s26] sm:$0xff] %vm324_vm6, %v313_v38 }
 0x188   : > { %385 = vst.msk [vmem:[%s707_s26 + $0x18] sm:$0x7f] %vm382_vm9, %v375_v47 }
 0x189   : > { %355 = vst.msk [vmem:[%s707_s26] sm:$0xff] %vm354_vm10, %v350_v48 }
 0x18a   : > { %381 = vst.msk [vmem:[%s707_s26] sm:$0xff] %vm380_vm11, %v369_v42 }
 0x1a6   : > { %v315_v43 = vpop.permute.xlu1 %314  ;;  %v371_v46 = vpop.permute.xlu0 %370 }
 0x1a7   : > { %327 = vst.msk [vmem:[%s707_s26 + $0x8] sm:$0x7f] %vm326_vm7, %v315_v43 }
 0x1a8   : > { %357 = vst.msk [vmem:[%s707_s26 + $0x8] sm:$0x7f] %vm356_vm8, %v351_v44 }
 0x1a9   : > { %383 = vst.msk [vmem:[%s707_s26 + $0x8] sm:$0x7f] %vm382_vm9, %v371_v46 }
 0x1ae   : > { %v317_v49 = vpop.permute.xlu1 %316 }
 0x1af   : > { %328 = vst.msk [vmem:[%s707_s26 + $0x10] sm:$0xff] %vm324_vm6, %v317_v49 }
 0x1b0   : > { %358 = vst.msk [vmem:[%s707_s26 + $0x10] sm:$0xff] %vm354_vm10, %v352_v50 }
 0x1b6   : > { %v373_v51 = vpop.permute.xlu1 %372 }
 0x1b7   : > { %384 = vst.msk [vmem:[%s707_s26 + $0x10] sm:$0xff] %vm380_vm11, %v373_v51 }
 0x1b8 PF: > { %p11_p7 = scmp.ge.s32.totalorder %s620_s11, 6   ;;  %s744_s6 = smov %s574_s7 }
 0x1b9   : > { %s745_s7 = smov %s578_s8  ;;  %s746_s8 = smov %s630_s14 }
 0x1ba   : > { %s747_s9 = smov %s620_s11  ;;  %13 = sbr.rel (!%p11_p7) target bundleno = 3 (0x3), region = 64 }
 0x1bf   :  { %410 = vsyncpa [#allocation4], 1 }
 0x1c0   :  { %412 = vsyncpa [#allocation4 + $0x1], 1 }

</bundles_post_ra>
